<compile_context>
chip_gen: v7x
topology: tpu7x:2x2x1
jax: 0.10.0
libtpu: 0.0.40
codegen_flags: <defaults>
</compile_context>

<pallas_src>
import jax
import jax.numpy as jnp
from jax.experimental import pallas as pl
from jax.experimental.pallas import tpu as pltpu


def _sgc_kernel(x_ref, w_ref, shift_ref, o_ref):
    # x_ref:     (Cin*V, TB)     bf16  sublane = (in-channel, joint), lane = time
    # w_ref:     (CO*V,  Cin*V)  bf16  fully folded weight (gcn (x) A + residual, BN scales)
    # shift_ref: (CO*V,  1)      f32   all biases + BN shifts
    # o_ref:     (CO*V,  TB)
    acc = jnp.dot(w_ref[...], x_ref[...], preferred_element_type=jnp.float32)
    # TODO(synk): activation_factory(act_type) is not given in the source; ReLU assumed.
    o_ref[...] = jnp.maximum(acc + shift_ref[...], 0.0).astype(o_ref.dtype)


def _choose_time_block(T, N, tb_target):
    """Time (lane) block: either the whole T as one full-extent block, or a multiple of 128."""
    if T <= tb_target and not (N == 1 and T >= 256):
        return T
    tb = max(128, (tb_target // 128) * 128)
    if N == 1:
        # keep >= 2 time blocks so both v7x TensorCores get work for streaming inference
        tb = min(tb, max(128, 128 * (pl.cdiv(T, 128) // 2)))
    return tb


def _choose_cout_block(Cout, V, CinV, budget_bytes):
    """Largest divisor of Cout whose folded-weight block (d*V, Cin*V) in bf16 fits the
    VMEM budget, subject to the sublane rule (d*V % 8 == 0 unless the block is full)."""
    divisors = [d for d in range(1, Cout + 1) if Cout % d == 0]
    legal = [d for d in divisors if (d * V) % 8 == 0 or d == Cout]
    fitting = [d for d in legal if d * V * CinV * 2 <= budget_bytes]
    return max(fitting) if fitting else min(legal)


def spatial_graph_conv(x, params, eps=1e-5, tb_target=256, w_budget_bytes=8 << 20,
                       compute_dtype=jnp.bfloat16, out_dtype=None):
    """x: (N, Cin, T, V) float32 (PyTorch NCHW).  Returns (N, Cout, T, V)."""
    N, Cin, T, V = x.shape
    K = params["A"].shape[0]
    KC = params["w_gcn"].shape[0]
    Cout = KC // K
    out_dtype = x.dtype if out_dtype is None else out_dtype

    # ----------------- wrapper-side folding (tiny tensors, one-off XLA ops) -----------------
    A_eff = (params["A"] * params["edge"]).astype(jnp.float32)              # (K, V, V)
    sm = params["bn_gamma"] / jnp.sqrt(params["bn_var"] + eps)              # main BN scale
    tm = params["bn_beta"] - params["bn_mean"] * sm
    sr = params["bnr_gamma"] / jnp.sqrt(params["bnr_var"] + eps)            # residual BN scale
    tr = params["bnr_beta"] - params["bnr_mean"] * sr

    wg = params["w_gcn"].reshape(K, Cout, Cin)
    # main path: W[c,w,ci,v] = sm[c] * sum_k wg[k,c,ci] * A_eff[k,v,w]
    w_main = jnp.einsum("kci,kvw->cwiv", wg, A_eff) * sm[:, None, None, None]
    # residual 1x1 conv (+ BN_r scale) is a delta in the joint index: += sr[c]*w_res[c,ci]*d[v,w]
    # TODO(synk): the module only defines the conv+BN residual for in_ch != out_ch; identity /
    #             no-residual configurations would simply drop this term.
    w_res = jnp.einsum("ci,vw->cwiv", params["w_res"] * sr[:, None],
                       jnp.eye(V, dtype=jnp.float32))
    w_total = (w_main + w_res).reshape(Cout * V, Cin * V)                   # rows=(c,w), cols=(ci,v)

    # shift[c,w] = sm[c]*sum_k b_gcn[k,c]*sum_v A_eff[k,v,w] + tm[c] + sr[c]*b_res[c] + tr[c]
    colsum_a = A_eff.sum(axis=1)                                            # (K, V) indexed [k, w]
    bias_main = jnp.einsum("kc,kw->cw", params["b_gcn"].reshape(K, Cout), colsum_a)
    shift = (sm[:, None] * bias_main + tm[:, None]
             + (sr * params["b_res"] + tr)[:, None])                        # (Cout, V)
    shift = shift.reshape(Cout * V, 1).astype(jnp.float32)

    # ----------------- tiling -----------------
    CinV, CoutV = Cin * V, Cout * V
    TB = _choose_time_block(T, N, tb_target)
    T_pad = pl.cdiv(T, TB) * TB
    num_tb = T_pad // TB
    CO = _choose_cout_block(Cout, V, CinV, w_budget_bytes)
    CO_rows = CO * V
    num_co = CoutV // CO_rows

    # ----------------- operand relayout (one-off, wrapper-side) -----------------
    # (N, Cin, T, V) -> (N, Cin*V, T): sublane = contraction dim (ci, v), lane = time.
    x2 = jnp.transpose(x, (0, 1, 3, 2)).reshape(N, CinV, T)
    if T_pad != T:
        x2 = jnp.pad(x2, ((0, 0), (0, 0), (0, T_pad - T)))
    x2 = x2.astype(compute_dtype)
    # v7x note: keep weights bf16 (fp8 is NOT a drop-in replacement for these weights).
    w2 = w_total.astype(compute_dtype)

    # Grid-invariant operands (single W / shift block) don't need a second pipeline buffer.
    if num_co == 1:
        w_spec = pl.BlockSpec((CO_rows, CinV), lambda co, n, t: (co, 0),
                              pipeline_mode=pl.Buffered(1))
        s_spec = pl.BlockSpec((CO_rows, 1), lambda co, n, t: (co, 0),
                              pipeline_mode=pl.Buffered(1))
    else:
        w_spec = pl.BlockSpec((CO_rows, CinV), lambda co, n, t: (co, 0))
        s_spec = pl.BlockSpec((CO_rows, 1), lambda co, n, t: (co, 0))

    out_itemsize = jnp.dtype(out_dtype).itemsize
    cost = pl.CostEstimate(
        flops=2 * N * T_pad * CoutV * CinV + 2 * N * T_pad * CoutV,
        transcendentals=0,
        bytes_accessed=int(x2.size * x2.dtype.itemsize * num_co
                           + w2.size * w2.dtype.itemsize
                           + shift.size * 4
                           + N * CoutV * T_pad * out_itemsize),
    )

    out = pl.pallas_call(
        _sgc_kernel,
        out_shape=jax.ShapeDtypeStruct((N, CoutV, T_pad), out_dtype),
        grid_spec=pltpu.PrefetchScalarGridSpec(
            num_scalar_prefetch=0,
            grid=(num_co, N, num_tb),          # co outermost -> each W block DMA'd once
            in_specs=[
                pl.BlockSpec((None, CinV, TB), lambda co, n, t: (n, 0, t)),   # x slab
                w_spec,                                                       # folded weight
                s_spec,                                                       # folded bias/BN shift
            ],
            out_specs=pl.BlockSpec((None, CO_rows, TB), lambda co, n, t: (n, co, t)),
        ),
        compiler_params=pltpu.CompilerParams(
            dimension_semantics=("parallel", "parallel", "parallel"),
            # <= ~48 MiB keeps v7x (64 MiB physical) safe; plenty of headroom on v5e/v6e.
            vmem_limit_bytes=48 * 1024 * 1024),
        cost_estimate=cost,
    )(x2, w2, shift)

    out = out.reshape(N, Cout, V, T_pad).transpose(0, 1, 3, 2)   # -> (N, Cout, T_pad, V)
    if T_pad != T:
        out = out[:, :, :T, :]
    return out


def reference(x, params, eps=1e-5):
    """Pure-JAX f32 reference mirroring the PyTorch forward (eval-mode BN, ReLU)."""
    K = params["A"].shape[0]
    KC = params["w_gcn"].shape[0]
    Cout = KC // K
    N, Cin, T, V = x.shape
    A_eff = params["A"] * params["edge"]

    y = jnp.einsum("oc,nctv->notv", params["w_gcn"], x) \
        + params["b_gcn"][None, :, None, None]
    y = y.reshape(N, K, Cout, T, V)
    agg = jnp.einsum("nkctv,kvw->nctw", y, A_eff)

    r = jnp.einsum("oc,nctv->notv", params["w_res"], x) \
        + params["b_res"][None, :, None, None]

    def bn(v, g, b, m, var):
        g, b, m, var = (a[None, :, None, None] for a in (g, b, m, var))
        return (v - m) / jnp.sqrt(var + eps) * g + b

    main = bn(agg, params["bn_gamma"], params["bn_beta"],
              params["bn_mean"], params["bn_var"])
    res = bn(r, params["bnr_gamma"], params["bnr_beta"],
             params["bnr_mean"], params["bnr_var"])
    return jax.nn.relu(main + res)


if __name__ == "__main__":
    N, Cin, Cout, T, V = 2, 4, 8, 16, 16
    max_graph_distance = 2
    K = max_graph_distance + 1          # s_kernel_size

    keys = jax.random.split(jax.random.PRNGKey(0), 14)
    x = jax.random.normal(keys[0], (N, Cin, T, V), jnp.float32)

    # Deterministic synthetic parameters (shapes per the module __init__, bias=True, edge=True).
    params = dict(
        w_gcn=jax.random.normal(keys[1], (K * Cout, Cin), jnp.float32) * 0.1,   # Conv2d(Cin, K*Cout, 1)
        b_gcn=jax.random.normal(keys[2], (K * Cout,), jnp.float32) * 0.1,
        w_res=jax.random.normal(keys[3], (Cout, Cin), jnp.float32) * 0.1,        # residual Conv2d(Cin, Cout, 1)
        b_res=jax.random.normal(keys[4], (Cout,), jnp.float32) * 0.1,
        A=jax.random.uniform(keys[5], (K, V, V), jnp.float32),                   # A[:s_kernel_size]
        edge=jnp.ones((K, V, V), jnp.float32),                                   # nn.Parameter(ones_like(A))
        bn_gamma=jax.random.uniform(keys[6], (Cout,), jnp.float32, 0.5, 1.5),
        bn_beta=jax.random.normal(keys[7], (Cout,), jnp.float32) * 0.1,
        bn_mean=jax.random.normal(keys[8], (Cout,), jnp.float32) * 0.1,
        bn_var=jax.random.uniform(keys[9], (Cout,), jnp.float32, 0.5, 1.5),
        bnr_gamma=jax.random.uniform(keys[10], (Cout,), jnp.float32, 0.5, 1.5),
        bnr_beta=jax.random.normal(keys[11], (Cout,), jnp.float32) * 0.1,
        bnr_mean=jax.random.normal(keys[12], (Cout,), jnp.float32) * 0.1,
        bnr_var=jax.random.uniform(keys[13], (Cout,), jnp.float32, 0.5, 1.5),
    )

    out = spatial_graph_conv(x, params)
    jax.block_until_ready(out)

    ref = reference(x, params)
    assert out.shape == (N, Cout, T, V), out.shape
    # bf16 MXU operands (single rounding of x and the folded weight, f32 accumulation)
    # -> compare against the f32 reference loosely.
    assert jnp.allclose(out, ref, rtol=3e-2, atol=3e-2), \
        float(jnp.max(jnp.abs(out - ref)))
    print("KERNEL_OK")
</pallas_src>

<mosaic_0001>
module attributes {stable_mosaic.version = 11 : i64} {
  func.func @_sgc_kernel(%arg0: i32, %arg1: i32, %arg2: i32, %arg3: memref<1x64x16xbf16, #tpu.memory_space<vmem>>, %arg4: memref<128x64xbf16, #tpu.memory_space<vmem>>, %arg5: memref<128x1xf32, #tpu.memory_space<vmem>>, %arg6: memref<1x128x16xf32, #tpu.memory_space<vmem>>) attributes {dimension_semantics = [#tpu.dimension_semantics<parallel>, #tpu.dimension_semantics<parallel>, #tpu.dimension_semantics<parallel>], iteration_bounds = array<i64: 1, 2, 1>, scalar_prefetch = 0 : i64, scratch_operands = 0 : i64, tpu.core_type = #tpu.core_type<tc>, window_params = [{transform_indices = @transform_0, window_bounds = array<i64: 1, 64, 16>}, {pipeline_mode = #tpu.pipeline_mode<synchronous>, transform_indices = @transform_1, window_bounds = array<i64: 128, 64>}, {pipeline_mode = #tpu.pipeline_mode<synchronous>, transform_indices = @transform_2, window_bounds = array<i64: 128, 1>}, {transform_indices = @transform_3, window_bounds = array<i64: 1, 128, 16>}]} {
    %c0 = arith.constant 0 : index
    %c0_0 = arith.constant 0 : index
    %0 = vector.load %arg4[%c0, %c0_0] : memref<128x64xbf16, #tpu.memory_space<vmem>>, vector<128x64xbf16>
    %c0_1 = arith.constant 0 : index
    %c0_2 = arith.constant 0 : index
    %c0_3 = arith.constant 0 : index
    %1 = vector.load %arg3[%c0_1, %c0_2, %c0_3] : memref<1x64x16xbf16, #tpu.memory_space<vmem>>, vector<1x64x16xbf16>
    %2 = vector.shape_cast %1 : vector<1x64x16xbf16> to vector<64x16xbf16>
    %cst = arith.constant dense<0.000000e+00> : vector<128x16xf32>
    %3 = tpu.matmul %0, %2, %cst {dimension_numbers = #tpu.dot_dimension_numbers<[1], [0], [0], [1], [0, 0, 1, 1], [], []>} : vector<128x64xbf16>, vector<64x16xbf16>, vector<128x16xf32> -> vector<128x16xf32>
    %c0_4 = arith.constant 0 : index
    %c0_5 = arith.constant 0 : index
    %4 = vector.load %arg5[%c0_4, %c0_5] : memref<128x1xf32, #tpu.memory_space<vmem>>, vector<128x1xf32>
    %5 = vector.broadcast %4 : vector<128x1xf32> to vector<128x16xf32>
    %6 = arith.addf %3, %5 : vector<128x16xf32>
    %cst_6 = arith.constant 0.000000e+00 : f32
    %7 = vector.broadcast %cst_6 : f32 to vector<128x16xf32>
    %8 = arith.maximumf %6, %7 : vector<128x16xf32>
    %c0_7 = arith.constant 0 : index
    %c0_8 = arith.constant 0 : index
    %c0_9 = arith.constant 0 : index
    %9 = vector.load %arg6[%c0_7, %c0_8, %c0_9] : memref<1x128x16xf32, #tpu.memory_space<vmem>>, vector<1x128x16xf32>
    %10 = vector.shape_cast %9 : vector<1x128x16xf32> to vector<128x16xf32>
    %11 = vector.shape_cast %8 : vector<128x16xf32> to vector<1x128x16xf32>
    tpu.vector_store %arg6[%c0_7, %c0_8, %c0_9], %11 {strides = array<i32>} : memref<1x128x16xf32, #tpu.memory_space<vmem>>, vector<1x128x16xf32>,
    return
  }
  func.func @transform_0(%arg0: i32, %arg1: i32, %arg2: i32) -> (i32, i32, i32) {
    %c0_i32 = arith.constant 0 : i32
    %c0_i32_0 = arith.constant 0 : i32
    return %arg1, %c0_i32, %arg2 : i32, i32, i32
  }
  func.func @transform_1(%arg0: i32, %arg1: i32, %arg2: i32) -> (i32, i32) {
    %c0_i32 = arith.constant 0 : i32
    %c0_i32_0 = arith.constant 0 : i32
    return %arg0, %c0_i32 : i32, i32
  }
  func.func @transform_2(%arg0: i32, %arg1: i32, %arg2: i32) -> (i32, i32) {
    %c0_i32 = arith.constant 0 : i32
    %c0_i32_0 = arith.constant 0 : i32
    return %arg0, %c0_i32 : i32, i32
  }
  func.func @transform_3(%arg0: i32, %arg1: i32, %arg2: i32) -> (i32, i32, i32) {
    %c0_i32 = arith.constant 0 : i32
    return %arg1, %arg0, %arg2 : i32, i32, i32
  }
}

</mosaic_0001>

<bundles_post_ra>
// kernel: tpu_custom_call.1
= control target key start
LH: loop header
LB: loop body
LE: loop exit
PB: predicated region body
PF: predicated region fallthrough
CT: control target
= control target key end

     0   :  { %s897_s12 = smov 0   ;;  %s899_s13 = smov 0   ;;  %s1051_s0 = inlined_call_operand.vmem [shape: bf16[2,64,16], index: 0, kind: input, shape index: {}]   ;;  %s1052_s1 = inlined_call_operand.vmem [shape: bf16[128,64], index: 1, kind: input, shape index: {}]   ;;  %s1053_s2 = inlined_call_operand.vmem [shape: f32[128,1], index: 2, kind: input, shape index: {}]   ;;  %s1054_s3 = inlined_call_operand.vmem [shape: f32[2,128,16], index: 3, kind: output, shape index: {}]  }
   0x1   :  { %s901_s14 = smov 0  }
   0x2 LB: > { %s28_s15 = sadd.s32 1, %s870_s13  ;;  %p740_p0 = scmp.ge.s32.totalorder %s874_s14, 1  ;;  %s874_s14 = sphi %s901_s14, %s13_s14   ;;  %s870_s13 = sphi %s899_s13, %s1056_s13   ;;  %s866_s12 = sphi %s897_s12, %s1055_s12  }
   0x3   : > { %p30_p1 = scmp.ge.s32.totalorder %s28_s15, 2  ;;  %p187_p2 = scmp.lt.s32.totalorder %s874_s14, 3 }
   0x5   : > { %s1058_s15 = smov (%p30_p1, %s28_s15), 0  ;;  %p188_p3 = pnand %p740_p0, %p187_p2 }
   0x6   : > { %p231_p4 = scmp.lt.s32.totalorder (!%p188_p3), %s866_s12, 1  ;;  %v844_v0 = vld [vmem:[%s1052_s1] sm:$0xff] (!%p188_p3)   ;;  %vm449_vm0 = vcmask (!%p188_p3), 523264   ;;  %v876_v2 = vmov (!%p188_p3), 0   ;;  %v291_v6 = vld [vmem:[%s1053_s2 + $0x10] sm:$0xff] (!%p188_p3)  ;;  %v292_v9 = vld [vmem:[%s1053_s2 + $0x18] sm:$0xff] (!%p188_p3) }
   0x7   : > { %191 = sbr.rel (%p188_p3) target bundleno = 262 (0x106), region = 32  ;;  %v845_v1 = vld [vmem:[%s1052_s1 + $0x20] sm:$0xff] (!%p188_p3)   ;;  %789 = vmatprep.mubr.msk.bf16.mxu0 (!%p188_p3), %vm449_vm0, %v844_v0  ;;  %839 = vset.pattern.permute.xlu1 (!%p188_p3), %v876_v2  ;;  %v290_v10 = vld [vmem:[%s1053_s2 + $0x8] sm:$0xff] (!%p188_p3)  ;;  %v848_v15 = vld [vmem:[%s1052_s1 + $0x10] sm:$0xff] (!%p188_p3)   ;;  %vm587_vm1 = vcmask (!%p188_p3), 130048  }
   0x8   : > { %797 = vmatprep.mubr.msk.bf16.mxu1 (!%p188_p3), %vm449_vm0, %v845_v1  ;;  %838 = vset.pattern.permute.xlu0 (!%p188_p3), %v876_v2  ;;  %v289_v7 = vld [vmem:[%s1053_s2] sm:$0xff] (!%p188_p3)  ;;  %v846_v11 = vld [vmem:[%s1052_s1 + $0x8] sm:$0xff] (!%p188_p3)   ;;  %v849_v16 = vld [vmem:[%s1052_s1 + $0x30] sm:$0xff] (!%p188_p3)  }
   0x9   : > { %317 = vperm.xlu1 (!%p188_p3), %839, %v291_v6   ;;  %307 = vperm.xlu0 (!%p188_p3), %838, %v289_v7   ;;  %v847_v12 = vld [vmem:[%s1052_s1 + $0x28] sm:$0xff] (!%p188_p3)   ;;  %v293_v14 = vld [vmem:[%s1053_s2 + $0x20] sm:$0xff] (!%p188_p3)  ;;  %v296_v17 = vld [vmem:[%s1053_s2 + $0x38] sm:$0xff] (!%p188_p3) }
   0xa   : > { %v294_v13 = vld [vmem:[%s1053_s2 + $0x28] sm:$0xff] (!%p188_p3)  ;;  %v295_v18 = vld [vmem:[%s1053_s2 + $0x30] sm:$0xff] (!%p188_p3)  ;;  %v850_v19 = vld [vmem:[%s1052_s1 + $0x18] sm:$0xff] (!%p188_p3)  }
   0xb   : > { %v851_v20 = vld [vmem:[%s1052_s1 + $0x38] sm:$0xff] (!%p188_p3)   ;;  %v298_v21 = vld [vmem:[%s1053_s2 + $0x48] sm:$0xff] (!%p188_p3)  ;;  %v297_v22 = vld [vmem:[%s1053_s2 + $0x40] sm:$0xff] (!%p188_p3) }
   0xc   : > { %v300_v23 = vld [vmem:[%s1053_s2 + $0x58] sm:$0xff] (!%p188_p3)  ;;  %v299_v24 = vld [vmem:[%s1053_s2 + $0x50] sm:$0xff] (!%p188_p3)  ;;  %v302_v25 = vld [vmem:[%s1053_s2 + $0x68] sm:$0xff] (!%p188_p3) }
   0xd   : > { %322 = vperm.xlu1 (!%p188_p3), %839, %v292_v9   ;;  %312 = vperm.xlu0 (!%p188_p3), %838, %v290_v10   ;;  %v301_v26 = vld [vmem:[%s1053_s2 + $0x60] sm:$0xff] (!%p188_p3)  ;;  %v304_v27 = vld [vmem:[%s1053_s2 + $0x78] sm:$0xff] (!%p188_p3)  ;;  %v303_v28 = vld [vmem:[%s1053_s2 + $0x70] sm:$0xff] (!%p188_p3) }
   0xe   : > { %s1060_s12 = smov (!%p231_p4, %s866_s12), 1 }
   0xf   : > { %s767_s20 = sshll.u32 %s1060_s12, 5  ;;  %s768_s22 = sshll.u32 %s1060_s12, 7 }
  0x10   : > { %s238_s23 = scalar_lea.vmem %s1051_s0, %s767_s20  ;;  %s1007_s25 = scalar_lea.vmem %s1054_s3, %s768_s22 }
  0x11   : > { %v840_v3 = vld [vmem:[%s238_s23] sm:$0xff]   ;;  %v841_v4 = vld [vmem:[%s238_s23 + $0x8] sm:$0xff]   ;;  %v842_v5 = vld [vmem:[%s238_s23 + $0x10] sm:$0xff]   ;;  %332 = vperm.xlu1 %839, %v294_v13   ;;  %327 = vperm.xlu0 %838, %v293_v14  }
  0x12   : > { %781 = vmatprep.subr.bf16.mxu0 %v840_v3  ;;  %805 = vmatprep.subr.bf16.mxu1 %v840_v3  ;;  %v843_v8 = vld [vmem:[%s238_s23 + $0x18] sm:$0xff]  }
  0x13   : > { %782 = vmatpush3.bf16.msra.mxu0 %v840_v3  ;;  %809 = vmatpush3.bf16.msra.mxu1 %v840_v3 }
  0x14   : > { %783 = vmatprep.subr.bf16.mxu0 %v841_v4  ;;  %806 = vmatprep.subr.bf16.mxu1 %v841_v4 }
  0x15   : > { %342 = vperm.xlu1 %839, %v296_v17   ;;  %337 = vperm.xlu0 %838, %v295_v18  }
  0x17   : > { %784 = vmatpush3.bf16.msra.mxu0 %v841_v4  ;;  %810 = vmatpush3.bf16.msra.mxu1 %v841_v4 }
  0x18   : > { %785 = vmatprep.subr.bf16.mxu0 %v842_v5  ;;  %807 = vmatprep.subr.bf16.mxu1 %v842_v5 }
  0x19   : > { %352 = vperm.xlu1 %839, %v298_v21   ;;  %347 = vperm.xlu0 %838, %v297_v22  }
  0x1b   : > { %786 = vmatpush3.bf16.msra.mxu0 %v842_v5  ;;  %811 = vmatpush3.bf16.msra.mxu1 %v842_v5 }
  0x1c   : > { %787 = vmatprep.subr.bf16.mxu0 %v843_v8  ;;  %808 = vmatprep.subr.bf16.mxu1 %v843_v8 }
  0x1d   : > { %362 = vperm.xlu1 %839, %v300_v23   ;;  %357 = vperm.xlu0 %838, %v299_v24  }
  0x1f   : > { %788 = vmatpush3.bf16.msra.mxu0 %v843_v8  ;;  %812 = vmatpush3.bf16.msra.mxu1 %v843_v8 }
  0x21   : > { %372 = vperm.xlu1 %839, %v302_v25   ;;  %367 = vperm.xlu0 %838, %v301_v26  }
  0x22   : > { %790 = vmatmul.mubr.msk.bf16.vlgmr.msra.gmra.mrb[0].mxu0 %vm449_vm0, %v846_v11  ;;  %798 = vmatmul.mubr.msk.bf16.vlgmr.msra.gmra.mrb[0].mxu1 %vm449_vm0, %v847_v12 }
  0x23   : > { %793 = vmatprep.mubr.msk.bf16.mxu0 %vm449_vm0, %v848_v15  ;;  %801 = vmatprep.mubr.msk.bf16.mxu1 %vm449_vm0, %v849_v16 }
  0x25   : > { %382 = vperm.xlu1 %839, %v304_v27   ;;  %377 = vperm.xlu0 %838, %v303_v28  }
  0x2a   : > { %794 = vmatmul.mubr.msk.bf16.gmra.mrb[4].mxu0 %vm449_vm0, %v850_v19  ;;  %802 = vmatmul.mubr.msk.bf16.gmra.mrb[4].mxu1 %vm449_vm0, %v851_v20 }
  0x88   : > { %v318_v29 = vpop.permute.xlu1 %317  ;;  %v308_v30 = vpop.permute.xlu0 %307 }
  0x8c   : > { %v323_v31 = vpop.permute.xlu1 %322  ;;  %v313_v32 = vpop.permute.xlu0 %312 }
  0x90   : > { %v1001_v33 = vpop.permute.xlu1 %332  ;;  %v328_v34 = vpop.permute.xlu0 %327 }
  0x94   : > { %v343_v35 = vpop.permute.xlu1 %342  ;;  %v338_v36 = vpop.permute.xlu0 %337 }
  0x98   : > { %v353_v37 = vpop.permute.xlu1 %352  ;;  %v348_v38 = vpop.permute.xlu0 %347 }
  0x9c   : > { %v363_v39 = vpop.permute.xlu1 %362  ;;  %v358_v40 = vpop.permute.xlu0 %357 }
  0xa0   : > { %v373_v41 = vpop.permute.xlu1 %372  ;;  %v368_v42 = vpop.permute.xlu0 %367 }
  0xa4   : > { %v383_v3 = vpop.permute.xlu1 %382  ;;  %v378_v4 = vpop.permute.xlu0 %377 }
  0xf5   : > { %v791_v43 = vpop.f32.mrb[0].mxu0  ;;  %v799_v44 = vpop.f32.mrb[0].mxu1 }
  0xf6   : > { %v517_v45 = vadd.f32 %v791_v43, %v318_v29  ;;  %v549_v46 = vadd.f32 %v799_v44, %v358_v40  ;;  %v508_v47 = vpop.f32.mrb[1].mxu0  ;;  %v540_v48 = vpop.f32.mrb[1].mxu1 }
  0xf7   : > { %v509_v49 = vadd.f32 %v508_v47, %v308_v30  ;;  %v541_v50 = vadd.f32 %v540_v48, %v348_v38  ;;  %v792_v51 = vpop.f32.mrb[2].mxu0  ;;  %v800_v52 = vpop.f32.mrb[2].mxu1 }
  0xf8   : > { %v573_v53 = vmax.f32 %v517_v45, 0.0  ;;  %v581_v54 = vmax.f32 %v549_v46, 0.0  ;;  %v520_v55 = vadd.f32 %v792_v51, %v323_v31  ;;  %v552_v56 = vadd.f32 %v800_v52, %v363_v39  ;;  %v511_v57 = vpop.f32.mrb[3].mxu0  ;;  %v543_v58 = vpop.f32.mrb[3].mxu1 }
  0xf9   : > { %v571_v59 = vmax.f32 %v509_v49, 0.0  ;;  %v579_v60 = vmax.f32 %v541_v50, 0.0  ;;  %v512_v61 = vadd.f32 %v511_v57, %v313_v32  ;;  %v544_v62 = vadd.f32 %v543_v58, %v353_v37 }
  0xfa   : > { %590 = vst.msk [vmem:[%s1007_s25 + $0x10] sm:$0xff] %vm587_vm1, %v573_v53  ;;  %598 = vst.msk [vmem:[%s1007_s25 + $0x50] sm:$0xff] %vm587_vm1, %v581_v54  ;;  %v574_v63 = vmax.f32 %v520_v55, 0.0  ;;  %v582_v0 = vmax.f32 %v552_v56, 0.0 }
  0xfb   : > { %588 = vst.msk [vmem:[%s1007_s25] sm:$0xff] %vm587_vm1, %v571_v59  ;;  %596 = vst.msk [vmem:[%s1007_s25 + $0x40] sm:$0xff] %vm587_vm1, %v579_v60  ;;  %v572_v1 = vmax.f32 %v512_v61, 0.0  ;;  %v580_v2 = vmax.f32 %v544_v62, 0.0 }
  0xfc   : > { %591 = vst.msk [vmem:[%s1007_s25 + $0x18] sm:$0xff] %vm587_vm1, %v574_v63  ;;  %599 = vst.msk [vmem:[%s1007_s25 + $0x58] sm:$0xff] %vm587_vm1, %v582_v0 }
  0xfd   : > { %589 = vst.msk [vmem:[%s1007_s25 + $0x8] sm:$0xff] %vm587_vm1, %v572_v1  ;;  %597 = vst.msk [vmem:[%s1007_s25 + $0x48] sm:$0xff] %vm587_vm1, %v580_v2  ;;  %v795_v5 = vpop.f32.mrb[4].mxu0  ;;  %v803_v6 = vpop.f32.mrb[4].mxu1 }
  0xfe   : > { %v533_v7 = vadd.f32 %v795_v5, %v338_v36  ;;  %v565_v8 = vadd.f32 %v803_v6, %v378_v4  ;;  %v524_v9 = vpop.f32.mrb[5].mxu0  ;;  %v556_v10 = vpop.f32.mrb[5].mxu1 }
  0xff   : > { %v525_v11 = vadd.f32 %v524_v9, %v328_v34  ;;  %v557_v12 = vadd.f32 %v556_v10, %v368_v42  ;;  %v796_v13 = vpop.f32.mrb[6].mxu0  ;;  %v804_v14 = vpop.f32.mrb[6].mxu1 }
 0x100   : > { %v577_v15 = vmax.f32 %v533_v7, 0.0  ;;  %v585_v16 = vmax.f32 %v565_v8, 0.0  ;;  %v536_v17 = vadd.f32 %v796_v13, %v343_v35  ;;  %v568_v18 = vadd.f32 %v804_v14, %v383_v3  ;;  %v527_v19 = vpop.f32.mrb[7].mxu0  ;;  %v559_v20 = vpop.f32.mrb[7].mxu1 }
 0x101   : > { %v575_v21 = vmax.f32 %v525_v11, 0.0  ;;  %v583_v22 = vmax.f32 %v557_v12, 0.0  ;;  %v528_v23 = vadd.f32 %v527_v19, %v1001_v33  ;;  %v560_v24 = vadd.f32 %v559_v20, %v373_v41 }
 0x102   : > { %594 = vst.msk [vmem:[%s1007_s25 + $0x30] sm:$0xff] %vm587_vm1, %v577_v15  ;;  %602 = vst.msk [vmem:[%s1007_s25 + $0x70] sm:$0xff] %vm587_vm1, %v585_v16  ;;  %v578_v25 = vmax.f32 %v536_v17, 0.0  ;;  %v586_v26 = vmax.f32 %v568_v18, 0.0 }
 0x103   : > { %592 = vst.msk [vmem:[%s1007_s25 + $0x20] sm:$0xff] %vm587_vm1, %v575_v21  ;;  %600 = vst.msk [vmem:[%s1007_s25 + $0x60] sm:$0xff] %vm587_vm1, %v583_v22  ;;  %v576_v27 = vmax.f32 %v528_v23, 0.0  ;;  %v584_v28 = vmax.f32 %v560_v24, 0.0 }
 0x104   : > { %595 = vst.msk [vmem:[%s1007_s25 + $0x38] sm:$0xff] %vm587_vm1, %v578_v25  ;;  %603 = vst.msk [vmem:[%s1007_s25 + $0x78] sm:$0xff] %vm587_vm1, %v586_v26 }
 0x105   : > { %593 = vst.msk [vmem:[%s1007_s25 + $0x28] sm:$0xff] %vm587_vm1, %v576_v27  ;;  %601 = vst.msk [vmem:[%s1007_s25 + $0x68] sm:$0xff] %vm587_vm1, %v584_v28 }
 0x106 PF: > { %s13_s14 = sadd.s32 1, %s874_s14   ;;  %s1055_s12 = smov %s870_s13 }
 0x107   : > { %p10_p5 = scmp.ge.s32.totalorder %s13_s14, 4   ;;  %s1056_s13 = smov %s1058_s15 }
 0x109   :  { %12 = sbr.rel (!%p10_p5) target bundleno = 2 (0x2), region = 68 }

</bundles_post_ra>
